<compile_context>
chip_gen: v5e
topology: v5e:2x2
jax: 0.10.0
libtpu: 0.0.40
codegen_flags: <defaults>
</compile_context>

<pallas_src>
import functools
import math

import jax
import jax.numpy as jnp
from jax.experimental import pallas as pl
from jax.experimental.pallas import tpu as pltpu


# ------------------------------ small helpers ------------------------------ #
def _round_up(v, m):
    return ((v + m - 1) // m) * m


def _pad2(x, rows, cols):
    r, c = x.shape
    if (r, c) == (rows, cols):
        return x
    return jnp.pad(x, ((0, rows - r), (0, cols - c)))


def _vmem_cap_bytes():
    """Physical VMEM per core; conservative fallback = v7x's 64 MiB."""
    try:
        info = pltpu.get_tpu_info()
        cap = getattr(info, "vmem_capacity_bytes", None)
        if cap:
            return int(cap)
    except Exception:
        pass
    return 64 << 20


def _vmem_limit(need_bytes):
    cap = _vmem_cap_bytes()
    return int(min(int(cap * 0.9), max(32 << 20, need_bytes + (8 << 20))))


def _pick_tile_m(M, tile_m):
    """Row-tile size: divides M (a multiple of 128), sublane-friendly, and
    gives >= 2 tiles when possible so the 'parallel' grid axis can shard
    across both v7x TensorCores."""
    tm = math.gcd(min(tile_m, M), M)
    if M // tm < 2 and M >= 256:
        tm = M // 2                      # multiple of 64 -> fine for f32/bf16
    assert tm % 16 == 0, tm
    return tm


def _resident_fits(M, K, F, compute_dtype, tile_m):
    """Can the (K, F) rhs stay fully resident in VMEM alongside the row tiles?"""
    it = jnp.dtype(compute_dtype).itemsize
    tm = _pick_tile_m(M, tile_m)
    need = 2 * tm * K * it + 2 * K * F * it + 2 * tm * F * 4 + (4 << 20)
    return need <= int(_vmem_cap_bytes() * 0.8)


# ------------- fused 2-layer kernel (whole padded graph in VMEM) ----------- #
def _gcn2_fused_kernel(a_ref, x_ref, w1_ref, b1_ref, w2_ref, b2_ref, o_ref):
    cd = a_ref.dtype                      # compute dtype (bf16 or f32)
    a = a_ref[...]
    # layer 1: H = relu(A @ (X @ W1) + b1)
    xw = jnp.dot(x_ref[...], w1_ref[...], preferred_element_type=jnp.float32)
    h = jnp.dot(a, xw.astype(cd), preferred_element_type=jnp.float32) + b1_ref[...]
    h = jnp.maximum(h, 0.0)
    # dropout: eval mode -> identity
    # layer 2: Y = A @ (H @ W2) + b2
    hw = jnp.dot(h.astype(cd), w2_ref[...], preferred_element_type=jnp.float32)
    y = jnp.dot(a, hw.astype(cd), preferred_element_type=jnp.float32) + b2_ref[...]
    o_ref[...] = y.astype(o_ref.dtype)


def _fused_vmem_need(N, Ci, Ch, Co, compute_dtype):
    it = jnp.dtype(compute_dtype).itemsize
    inputs = (N * N + N * Ci + Ci * Ch + Ch * Co) * it + (Ch + Co) * 4
    inter = 3 * N * Ch * 4 + 3 * N * Co * 4      # f32 intermediates (upper bound)
    return inputs + inter + N * Co * 4


def gcn2_fused(a_norm, x, w1, b1, w2, b2, *, compute_dtype=jnp.bfloat16):
    """Fused 2-layer GCN forward; whole padded graph stays in VMEM.

    No grid -> single-buffered operands (no pipeline double-buffering of the
    NxN adjacency), one kernel launch, no HBM round-trip of the hidden
    activation.  Eligibility is decided from a dtype-aware VMEM estimate.
    TODO(synk): fused path uses one TensorCore; larger graphs take the tiled
    path whose 'parallel' row axis shards across both v7x cores.
    """
    n = a_norm.shape[0]
    c_out = w2.shape[1]
    N = _round_up(n, 128)
    Ci = _round_up(w1.shape[0], 128)
    Ch = _round_up(w1.shape[1], 128)
    Co = _round_up(c_out, 128)

    a_p = _pad2(a_norm, N, N).astype(compute_dtype)
    x_p = _pad2(x, N, Ci).astype(compute_dtype)
    w1_p = _pad2(w1, Ci, Ch).astype(compute_dtype)
    w2_p = _pad2(w2, Ch, Co).astype(compute_dtype)
    b1_p = _pad2(b1.reshape(1, -1), 1, Ch).astype(jnp.float32)
    b2_p = _pad2(b2.reshape(1, -1), 1, Co).astype(jnp.float32)

    need = _fused_vmem_need(N, Ci, Ch, Co, compute_dtype)
    out = pl.pallas_call(
        _gcn2_fused_kernel,
        out_shape=jax.ShapeDtypeStruct((N, Co), jnp.float32),
        compiler_params=pltpu.CompilerParams(vmem_limit_bytes=_vmem_limit(need)),
    )(a_p, x_p, w1_p, b1_p, w2_p, b2_p)
    return out[:n, :c_out]


# ----------------- generic layer kernels (tiled per-layer path) ------------ #
def _layer_resident_kernel(*refs, has_w, has_b, apply_relu):
    """y = (lhs_tile @ rhs) [@ W] [+ b] [relu]; rhs / W / b fully resident."""
    lhs_ref, rhs_ref = refs[0], refs[1]
    i = 2
    w_ref = b_ref = None
    if has_w:
        w_ref = refs[i]; i += 1
    if has_b:
        b_ref = refs[i]; i += 1
    o_ref = refs[i]

    y = jnp.dot(lhs_ref[...], rhs_ref[...], preferred_element_type=jnp.float32)
    if has_w:
        # second matmul in compute dtype (bf16 fast MXU path), f32 accumulate
        y = jnp.dot(y.astype(w_ref.dtype), w_ref[...],
                    preferred_element_type=jnp.float32)
    if has_b:
        y = y + b_ref[...]
    if apply_relu:
        y = jnp.maximum(y, 0.0)
    o_ref[...] = y.astype(o_ref.dtype)


def dense_layer_resident(lhs, rhs, w=None, b=None, *, apply_relu=False,
                         out_dtype=jnp.float32, tile_m=256):
    """Row-tiled  (lhs @ rhs) [@ W] + b [relu]  with rhs resident in VMEM.

    lhs (M, K) is streamed from HBM exactly once (one row tile per grid step);
    rhs (K, F), W, b have constant index_maps so they are fetched once for the
    whole grid.  Row axis is 'parallel' (megacore / 2-TC v7x).
    """
    M, K = lhs.shape
    K2, F = rhs.shape
    assert K == K2
    Co = w.shape[1] if w is not None else F
    tm = _pick_tile_m(M, tile_m)

    in_specs = [pl.BlockSpec((tm, K), lambda i: (i, 0)),   # lhs row tile
                pl.BlockSpec((K, F), lambda i: (0, 0))]    # rhs resident
    args = [lhs, rhs]
    if w is not None:
        in_specs.append(pl.BlockSpec((F, Co), lambda i: (0, 0)))
        args.append(w)
    if b is not None:
        in_specs.append(pl.BlockSpec((1, Co), lambda i: (0, 0)))
        args.append(b)

    it = lambda a: jnp.dtype(a.dtype).itemsize
    need = (2 * tm * K * it(lhs) + 2 * K * F * it(rhs)
            + (2 * F * Co * it(w) if w is not None else 0)
            + (2 * Co * 4 if b is not None else 0)
            + 2 * tm * Co * jnp.dtype(out_dtype).itemsize
            + tm * F * 4 + tm * Co * 4)

    kernel = functools.partial(_layer_resident_kernel, has_w=w is not None,
                               has_b=b is not None, apply_relu=apply_relu)
    return pl.pallas_call(
        kernel,
        out_shape=jax.ShapeDtypeStruct((M, Co), out_dtype),
        grid=(M // tm,),
        in_specs=in_specs,
        out_specs=pl.BlockSpec((tm, Co), lambda i: (i, 0)),
        compiler_params=pltpu.CompilerParams(
            dimension_semantics=("parallel",),
            vmem_limit_bytes=_vmem_limit(need)),
    )(*args)


def _layer_ktiled_kernel(*refs, has_w, has_b, apply_relu):
    """Reduction-tiled fallback: accumulate lhs_tile @ rhs_ktile in f32 VMEM."""
    lhs_ref, rhs_ref = refs[0], refs[1]
    i = 2
    w_ref = b_ref = None
    if has_w:
        w_ref = refs[i]; i += 1
    if has_b:
        b_ref = refs[i]; i += 1
    o_ref, acc_ref = refs[i], refs[i + 1]
    k = pl.program_id(1)

    @pl.when(k == 0)
    def _init():
        acc_ref[...] = jnp.zeros_like(acc_ref)

    acc_ref[...] += jnp.dot(lhs_ref[...], rhs_ref[...],
                            preferred_element_type=jnp.float32)

    @pl.when(k == pl.num_programs(1) - 1)
    def _finalize():
        y = acc_ref[...]
        if has_w:
            # W stays in compute dtype; cast the f32 accumulator so the MXU
            # runs the fast bf16 x bf16 -> f32 path instead of f32 x f32.
            y = jnp.dot(y.astype(w_ref.dtype), w_ref[...],
                        preferred_element_type=jnp.float32)
        if has_b:
            y = y + b_ref[...]
        if apply_relu:
            y = jnp.maximum(y, 0.0)
        o_ref[...] = y.astype(o_ref.dtype)


def dense_layer_ktiled(lhs, rhs, w=None, b=None, *, apply_relu=False,
                       out_dtype=jnp.float32, tile_m=256, tile_k=512):
    """Fallback for large N where rhs cannot stay resident in VMEM."""
    M, K = lhs.shape
    K2, F = rhs.shape
    assert K == K2
    Co = w.shape[1] if w is not None else F
    tm = _pick_tile_m(M, tile_m)
    tk = math.gcd(min(tile_k, K), K)
    assert tk % 128 == 0, tk

    in_specs = [pl.BlockSpec((tm, tk), lambda i, k: (i, k)),   # lhs tile
                pl.BlockSpec((tk, F), lambda i, k: (k, 0))]    # rhs k-tile
    args = [lhs, rhs]
    if w is not None:
        in_specs.append(pl.BlockSpec((F, Co), lambda i, k: (0, 0)))
        args.append(w)
    if b is not None:
        in_specs.append(pl.BlockSpec((1, Co), lambda i, k: (0, 0)))
        args.append(b)

    it = lambda a: jnp.dtype(a.dtype).itemsize
    need = (2 * tm * tk * it(lhs) + 2 * tk * F * it(rhs)
            + (2 * F * Co * it(w) if w is not None else 0)
            + 2 * tm * Co * jnp.dtype(out_dtype).itemsize
            + tm * F * 4 + tm * Co * 4)

    kernel = functools.partial(_layer_ktiled_kernel, has_w=w is not None,
                               has_b=b is not None, apply_relu=apply_relu)
    return pl.pallas_call(
        kernel,
        out_shape=jax.ShapeDtypeStruct((M, Co), out_dtype),
        grid=(M // tm, K // tk),                      # reduction axis last
        in_specs=in_specs,
        out_specs=pl.BlockSpec((tm, Co), lambda i, k: (i, 0)),
        scratch_shapes=[pltpu.VMEM((tm, F), jnp.float32)],
        compiler_params=pltpu.CompilerParams(
            dimension_semantics=("parallel", "arbitrary"),
            vmem_limit_bytes=_vmem_limit(need)),
    )(*args)


# ----------------------------- forward / glue ------------------------------ #
def gcn_forward(params, a_norm, edges=None, *, compute_dtype=jnp.bfloat16,
                fuse=None, tile_m=256, tile_k=512, layer_impl=None):
    """GCN.forward().  `edges` is accepted but unused (as in the reference).

    compute_dtype: dtype of A / X / W fed to the MXU (always f32 accumulation).
      bf16 (default) is the fast MXU / half-HBM-traffic path on v6e / v7x;
      pass jnp.float32 if adjacency normalization needs full precision.
    layer_impl: None (auto) | "resident" | "ktiled" (force tiled sub-path).
    """
    del edges  # present in the reference signature, unused in forward()
    ws, bs = params["conv_w"], params["conv_b"]
    n = a_norm.shape[0]
    c_out = ws[-1].shape[1]
    N = _round_up(n, 128)

    if fuse is None:
        fuse = (len(ws) == 2 and N <= 2048 and layer_impl is None and
                _fused_vmem_need(N, _round_up(ws[0].shape[0], 128),
                                 _round_up(ws[0].shape[1], 128),
                                 _round_up(c_out, 128), compute_dtype)
                <= int(_vmem_cap_bytes() * 0.8))
    if fuse and len(ws) == 2:
        return gcn2_fused(a_norm, params["embedding"], ws[0], bs[0], ws[1], bs[1],
                          compute_dtype=compute_dtype)

    # Tiled per-layer path: pad once, keep activations padded and in
    # compute_dtype between layers (no wrapper-side casts / extra HBM passes).
    a_p = _pad2(a_norm, N, N).astype(compute_dtype)
    x_p = _pad2(params["embedding"], N, _round_up(ws[0].shape[0], 128)
                ).astype(compute_dtype)

    for li, (w, b) in enumerate(zip(ws, bs)):
        last = (li == len(ws) - 1)
        Ci = _round_up(w.shape[0], 128)
        Co = _round_up(w.shape[1], 128)
        w_p = _pad2(w, Ci, Co).astype(compute_dtype)
        b_p = _pad2(b.reshape(1, -1), 1, Co).astype(jnp.float32)
        out_dtype = jnp.float32 if last else compute_dtype

        # Association choice: run the dominant N^2 A-reduction against the
        # narrower operand.  If Co < Ci, fold W first (XW = X @ W once).
        fold_w_first = Co < Ci
        if fold_w_first:
            xw = dense_layer_resident(x_p, w_p, out_dtype=compute_dtype,
                                      tile_m=tile_m)
            rhs, w_arg, Kf = xw, None, Co
        else:
            rhs, w_arg, Kf = x_p, w_p, Ci

        use_resident = (layer_impl != "ktiled" and
                        (layer_impl == "resident" or
                         _resident_fits(N, N, Kf, compute_dtype, tile_m)))
        if use_resident:
            x_p = dense_layer_resident(a_p, rhs, w_arg, b_p,
                                       apply_relu=not last,
                                       out_dtype=out_dtype, tile_m=tile_m)
        else:
            x_p = dense_layer_ktiled(a_p, rhs, w_arg, b_p,
                                     apply_relu=not last,
                                     out_dtype=out_dtype,
                                     tile_m=tile_m, tile_k=tile_k)
        # dropout: eval mode -> identity
    return x_p[:n, :c_out]


def glorot(key, shape):
    fan_in, fan_out = shape
    limit = jnp.sqrt(6.0 / (fan_in + fan_out))
    return jax.random.uniform(key, shape, jnp.float32, -limit, limit)


def gcn_norm_dense(adj):
    """GCNConv normalization on a dense adjacency: D^-1/2 (A + I) D^-1/2."""
    n = adj.shape[0]
    a_hat = adj + jnp.eye(n, dtype=adj.dtype)
    deg = a_hat.sum(axis=1)
    d_inv_sqrt = jnp.where(deg > 0, 1.0 / jnp.sqrt(deg), 0.0)
    return a_hat * d_inv_sqrt[:, None] * d_inv_sqrt[None, :]


def init_gcn_params(key, num_nodes, embedding_dim, hidden_dim, output_dim,
                    num_layers):
    in_dims = [embedding_dim] + [hidden_dim] * (num_layers - 1)
    out_dims = [hidden_dim] * (num_layers - 1) + [output_dim]
    keys = jax.random.split(key, num_layers + 1)
    return {
        "embedding": glorot(keys[0], (num_nodes, embedding_dim)),
        "conv_w": [glorot(keys[i + 1], (in_dims[i], out_dims[i]))
                   for i in range(num_layers)],
        "conv_b": [jnp.zeros((out_dims[i],), jnp.float32)
                   for i in range(num_layers)],
    }


def ref_forward(params, a_norm):
    x = params["embedding"]
    L = len(params["conv_w"])
    for i in range(L):
        x = a_norm @ (x @ params["conv_w"][i]) + params["conv_b"][i][None, :]
        if i < L - 1:
            x = jnp.maximum(x, 0.0)
    return x


# --------------------------------- main ------------------------------------ #
if __name__ == "__main__":
    key = jax.random.PRNGKey(0)
    k_par, k_adj, k_edges, k2_par, k2_adj = jax.random.split(key, 5)

    # ---- Test 1: spec-like small config (fused 2-layer kernel) ----
    num_nodes, emb_dim, hid_dim, out_dim, num_layers = 64, 32, 32, 32, 2
    num_query_edges = 8

    params = init_gcn_params(k_par, num_nodes, emb_dim, hid_dim, out_dim,
                             num_layers)
    a_rand = jax.random.uniform(k_adj, (num_nodes, num_nodes)) < 0.1
    adj = jnp.triu(a_rand.astype(jnp.float32), k=1)
    adj = adj + adj.T
    a_norm = gcn_norm_dense(adj)
    edges = jax.random.randint(k_edges, (2, num_query_edges), 0, num_nodes)

    ref = ref_forward(params, a_norm)

    # default: bf16 MXU inputs with f32 accumulation
    out = jax.block_until_ready(gcn_forward(params, a_norm, edges))
    assert out.shape == (num_nodes, out_dim)
    assert jnp.isfinite(out).all()
    scale = float(jnp.abs(ref).max()) + 1e-6
    assert float(jnp.abs(out - ref).max()) / scale < 3e-2, \
        float(jnp.abs(out - ref).max())

    # full f32 compute for tight numerics
    out_f32 = jax.block_until_ready(
        gcn_forward(params, a_norm, edges, compute_dtype=jnp.float32))
    assert jnp.allclose(out_f32, ref, atol=1e-4, rtol=1e-4), \
        float(jnp.abs(out_f32 - ref).max())

    # ---- Test 2: tiled per-layer path (3 layers, non-aligned dims, W-fold) --
    n2, emb2, hid2, out2, L2 = 200, 48, 256, 40, 3
    params2 = init_gcn_params(k2_par, n2, emb2, hid2, out2, L2)
    a_rand2 = jax.random.uniform(k2_adj, (n2, n2)) < 0.05
    adj2 = jnp.triu(a_rand2.astype(jnp.float32), k=1)
    adj2 = adj2 + adj2.T
    a_norm2 = gcn_norm_dense(adj2)
    ref2 = ref_forward(params2, a_norm2)

    # resident-X tiled path, f32 (tight tolerance)
    out_res = jax.block_until_ready(
        gcn_forward(params2, a_norm2, None, compute_dtype=jnp.float32,
                    fuse=False, tile_m=128))
    assert out_res.shape == (n2, out2)
    assert jnp.isfinite(out_res).all()
    assert jnp.allclose(out_res, ref2, atol=1e-3, rtol=1e-3), \
        float(jnp.abs(out_res - ref2).max())

    # k-tiled fallback path, default bf16 compute
    out_kt = jax.block_until_ready(
        gcn_forward(params2, a_norm2, None, fuse=False,
                    tile_m=128, tile_k=128, layer_impl="ktiled"))
    assert jnp.isfinite(out_kt).all()
    scale2 = float(jnp.abs(ref2).max()) + 1e-6
    assert float(jnp.abs(out_kt - ref2).max()) / scale2 < 3e-2, \
        float(jnp.abs(out_kt - ref2).max())

    print("KERNEL_OK")
</pallas_src>

<mosaic_0001>
module attributes {stable_mosaic.version = 11 : i64} {
  func.func @_gcn2_fused_kernel(%arg0: memref<128x128xbf16, #tpu.memory_space<vmem>>, %arg1: memref<128x128xbf16, #tpu.memory_space<vmem>>, %arg2: memref<128x128xbf16, #tpu.memory_space<vmem>>, %arg3: memref<1x128xf32, #tpu.memory_space<vmem>>, %arg4: memref<128x128xbf16, #tpu.memory_space<vmem>>, %arg5: memref<1x128xf32, #tpu.memory_space<vmem>>, %arg6: memref<128x128xf32, #tpu.memory_space<vmem>>) attributes {dimension_semantics = [], scalar_prefetch = 0 : i64, scratch_operands = 0 : i64, tpu.core_type = #tpu.core_type<tc>} {
    %c0 = arith.constant 0 : index
    %c0_0 = arith.constant 0 : index
    %0 = vector.load %arg0[%c0, %c0_0] : memref<128x128xbf16, #tpu.memory_space<vmem>>, vector<128x128xbf16>
    %c0_1 = arith.constant 0 : index
    %c0_2 = arith.constant 0 : index
    %1 = vector.load %arg1[%c0_1, %c0_2] : memref<128x128xbf16, #tpu.memory_space<vmem>>, vector<128x128xbf16>
    %c0_3 = arith.constant 0 : index
    %c0_4 = arith.constant 0 : index
    %2 = vector.load %arg2[%c0_3, %c0_4] : memref<128x128xbf16, #tpu.memory_space<vmem>>, vector<128x128xbf16>
    %cst = arith.constant dense<0.000000e+00> : vector<128x128xf32>
    %3 = tpu.matmul %1, %2, %cst {dimension_numbers = #tpu.dot_dimension_numbers<[1], [0], [0], [1], [0, 0, 1, 1], [], []>} : vector<128x128xbf16>, vector<128x128xbf16>, vector<128x128xf32> -> vector<128x128xf32>
    %4 = arith.truncf %3 : vector<128x128xf32> to vector<128x128xbf16>
    %cst_5 = arith.constant dense<0.000000e+00> : vector<128x128xf32>
    %5 = tpu.matmul %0, %4, %cst_5 {dimension_numbers = #tpu.dot_dimension_numbers<[1], [0], [0], [1], [0, 0, 1, 1], [], []>} : vector<128x128xbf16>, vector<128x128xbf16>, vector<128x128xf32> -> vector<128x128xf32>
    %c0_6 = arith.constant 0 : index
    %c0_7 = arith.constant 0 : index
    %6 = vector.load %arg3[%c0_6, %c0_7] : memref<1x128xf32, #tpu.memory_space<vmem>>, vector<1x128xf32>
    %7 = vector.broadcast %6 : vector<1x128xf32> to vector<128x128xf32>
    %8 = arith.addf %5, %7 : vector<128x128xf32>
    %cst_8 = arith.constant 0.000000e+00 : f32
    %9 = vector.broadcast %cst_8 : f32 to vector<128x128xf32>
    %10 = arith.maximumf %8, %9 : vector<128x128xf32>
    %11 = arith.truncf %10 : vector<128x128xf32> to vector<128x128xbf16>
    %c0_9 = arith.constant 0 : index
    %c0_10 = arith.constant 0 : index
    %12 = vector.load %arg4[%c0_9, %c0_10] : memref<128x128xbf16, #tpu.memory_space<vmem>>, vector<128x128xbf16>
    %cst_11 = arith.constant dense<0.000000e+00> : vector<128x128xf32>
    %13 = tpu.matmul %11, %12, %cst_11 {dimension_numbers = #tpu.dot_dimension_numbers<[1], [0], [0], [1], [0, 0, 1, 1], [], []>} : vector<128x128xbf16>, vector<128x128xbf16>, vector<128x128xf32> -> vector<128x128xf32>
    %14 = arith.truncf %13 : vector<128x128xf32> to vector<128x128xbf16>
    %cst_12 = arith.constant dense<0.000000e+00> : vector<128x128xf32>
    %15 = tpu.matmul %0, %14, %cst_12 {dimension_numbers = #tpu.dot_dimension_numbers<[1], [0], [0], [1], [0, 0, 1, 1], [], []>} : vector<128x128xbf16>, vector<128x128xbf16>, vector<128x128xf32> -> vector<128x128xf32>
    %c0_13 = arith.constant 0 : index
    %c0_14 = arith.constant 0 : index
    %16 = vector.load %arg5[%c0_13, %c0_14] : memref<1x128xf32, #tpu.memory_space<vmem>>, vector<1x128xf32>
    %17 = vector.broadcast %16 : vector<1x128xf32> to vector<128x128xf32>
    %18 = arith.addf %15, %17 : vector<128x128xf32>
    %c0_15 = arith.constant 0 : index
    %c0_16 = arith.constant 0 : index
    %19 = vector.load %arg6[%c0_15, %c0_16] : memref<128x128xf32, #tpu.memory_space<vmem>>, vector<128x128xf32>
    tpu.vector_store %arg6[%c0_15, %c0_16], %18 {strides = array<i32>} : memref<128x128xf32, #tpu.memory_space<vmem>>, vector<128x128xf32>,
    return
  }
}

</mosaic_0001>

<bundles_post_ra>
// kernel: tpu_custom_call.1
= control target key start
LH: loop header
LB: loop body
LE: loop exit
PB: predicated region body
PF: predicated region fallthrough
CT: control target
= control target key end

     0   :  { %11 = vsyncpa [#allocation3], 0  ;;  %s1020_s0 = inlined_call_operand.hbm [shape: bf16[128,128], index: 0, kind: input, shape index: {}]   ;;  %s1021_s1 = inlined_call_operand.hbm [shape: bf16[128,128], index: 1, kind: input, shape index: {}]   ;;  %s1022_s2 = inlined_call_operand.hbm [shape: bf16[128,128], index: 2, kind: input, shape index: {}]   ;;  %s1023_s3 = inlined_call_operand.vmem [shape: f32[1,128], index: 3, kind: input, shape index: {}]   ;;  %s1024_s4 = inlined_call_operand.hbm [shape: bf16[128,128], index: 4, kind: input, shape index: {}]   ;;  %s1025_s5 = inlined_call_operand.vmem [shape: f32[1,128], index: 5, kind: input, shape index: {}]   ;;  %s1026_s6 = inlined_call_operand.hbm [shape: f32[128,128], index: 6, kind: output, shape index: {}]  }
   0x1   :  { %12 = vsyncpa [#allocation6], 0 }
   0x2   :  { %13 = vsyncpa [#allocation9], 0 }
   0x3   :  { %14 = vsyncpa [#allocation4], 0  ;;  %s32_s23 = sshll.u32 %s1021_s1, 4  ;;  %s923_s24 = smov [#allocation5]   ;;  %s33_s23 = int_to_ptr.hbm [resolvable:$true] %s32_s23 }
   0x4   :  { %s34_s25 = sshll.u32 %s923_s24, 4  ;;  %s19_s28 = sshll.u32 %s1020_s0, 4  ;;  %s35_s25 = int_to_ptr.vmem [resolvable:$true] %s34_s25  ;;  %s20_s28 = int_to_ptr.hbm [resolvable:$true] %s19_s28 }
   0x5   :  { %s924_s29 = smov 64   ;;  %s925_s30 = smov 4  }
   0x6   :  { %40 = dma.hbm_to_vmem [thread:$0]  %s33_s23, 1024, %s35_s25, [#allocation6], %s924_s29, %s924_s29, %s925_s30  }
   0x7   :  { %s926_s7 = smov [#allocation2]   ;;  %s45_s11 = sshll.u32 %s1022_s2, 4  ;;  %s46_s11 = int_to_ptr.hbm [resolvable:$true] %s45_s11 }
   0x8   :  { %s21_s8 = sshll.u32 %s926_s7, 4  ;;  %s60_s13 = sshll.u32 %s1024_s4, 4  ;;  %s22_s8 = int_to_ptr.vmem [resolvable:$true] %s21_s8  ;;  %s61_s13 = int_to_ptr.hbm [resolvable:$true] %s60_s13 }
   0x9   :  { %27 = dma.hbm_to_vmem [thread:$0]  %s20_s28, 1024, %s22_s8, [#allocation3], %s924_s29, %s924_s29, %s925_s30  }
   0xa   :  { %s927_s14 = smov [#allocation7]   ;;  %s928_s0 = smov [#allocation8]  }
   0xb   :  { %s47_s15 = sshll.u32 %s927_s14, 4  ;;  %s62_s16 = sshll.u32 %s928_s0, 4  ;;  %s48_s15 = int_to_ptr.vmem [resolvable:$true] %s47_s15  ;;  %s63_s16 = int_to_ptr.vmem [resolvable:$true] %s62_s16 }
   0xc   :  { %53 = dma.hbm_to_vmem [thread:$0]  %s46_s11, 1024, %s48_s15, [#allocation6], %s924_s29, %s924_s29, %s925_s30  }
   0xd   :  { %68 = dma.hbm_to_vmem [thread:$0]  %s61_s13, 1024, %s63_s16, [#allocation9], %s924_s29, %s924_s29, %s925_s30  }
   0xe   :  { %915 = dma.done.wait [#allocation3], 1024  }
   0xf   :  { %916 = vsyncadd [#allocation3], 4294966272 }
  0x10   :  { %917 = dma.done.wait [#allocation6], 2048  }
  0x11   :  { %918 = vsyncadd [#allocation6], 4294965248 }
  0x12   :  { %919 = dma.done.wait [#allocation9], 1024  }
  0x13   :  { %920 = vsyncadd [#allocation9], 4294966272  ;;  %v775_v0 = vld [vmem:[#allocation7 + $0x38] sm:$0xff]  ;;  %v774_v1 = vld [vmem:[#allocation7 + $0x30] sm:$0xff]  ;;  %s609_s21 = sshll.u32 %s1026_s6, 4  ;;  %s930_s22 = smov 128   ;;  %s610_s21 = int_to_ptr.hbm [resolvable:$true] %s609_s21 }
  0x14   :  { %231 = vmatpush.bf16.msra.mxu0 %v775_v0  ;;  %v773_v2 = vld [vmem:[#allocation7 + $0x28] sm:$0xff]  ;;  %v772_v3 = vld [vmem:[#allocation7 + $0x20] sm:$0xff]  ;;  %v771_v4 = vld [vmem:[#allocation7 + $0x18] sm:$0xff]  ;;  %s931_s23 = smov 8  }
  0x15   :  { %v770_v5 = vld [vmem:[#allocation7 + $0x10] sm:$0xff]  ;;  %v769_v6 = vld [vmem:[#allocation7 + $0x8] sm:$0xff]  ;;  %v768_v7 = vld [vmem:[#allocation7] sm:$0xff] }
  0x16   :  { %v760_v8 = vld [vmem:[#allocation5] sm:$0xff]  ;;  %v761_v9 = vld [vmem:[#allocation5 + $0x8] sm:$0xff]  ;;  %v762_v10 = vld [vmem:[#allocation5 + $0x10] sm:$0xff] }
  0x17   :  { %v763_v11 = vld [vmem:[#allocation5 + $0x18] sm:$0xff]  ;;  %v764_v12 = vld [vmem:[#allocation5 + $0x20] sm:$0xff]  ;;  %v765_v13 = vld [vmem:[#allocation5 + $0x28] sm:$0xff] }
  0x18   :  { %232 = vmatpush.bf16.msra.mxu0 %v774_v1  ;;  %v766_v14 = vld [vmem:[#allocation5 + $0x30] sm:$0xff]  ;;  %v767_v15 = vld [vmem:[#allocation5 + $0x38] sm:$0xff]  ;;  %v979_v40 = vld [vmem:[#allocation2] sm:$0xff] }
  0x19   :  { %v982_v41 = vld [vmem:[#allocation2 + $0x8] sm:$0xff]  ;;  %v985_v42 = vld [vmem:[#allocation2 + $0x10] sm:$0xff]  ;;  %v988_v43 = vld [vmem:[#allocation2 + $0x18] sm:$0xff] }
  0x1a   :  { %v991_v44 = vld [vmem:[#allocation2 + $0x20] sm:$0xff]  ;;  %v783_v45 = vld [vmem:[#allocation8 + $0x38] sm:$0xff]  ;;  %v994_v46 = vld [vmem:[#allocation2 + $0x28] sm:$0xff] }
  0x1b   :  { %477 = vmatpush.bf16.msra.mxu2 %v783_v45  ;;  %v782_v47 = vld [vmem:[#allocation8 + $0x30] sm:$0xff]  ;;  %v781_v48 = vld [vmem:[#allocation8 + $0x28] sm:$0xff]  ;;  %v780_v49 = vld [vmem:[#allocation8 + $0x20] sm:$0xff] }
  0x1c   :  { %233 = vmatpush.bf16.msra.mxu0 %v773_v2  ;;  %v779_v50 = vld [vmem:[#allocation8 + $0x18] sm:$0xff]  ;;  %v997_v51 = vld [vmem:[#allocation2 + $0x30] sm:$0xff]  ;;  %v777_v53 = vld [vmem:[#allocation8 + $0x8] sm:$0xff] }
  0x1d   :  { %v778_v52 = vld [vmem:[#allocation8 + $0x10] sm:$0xff]  ;;  %v776_v54 = vld [vmem:[#allocation8] sm:$0xff]  ;;  %v1000_v55 = vld [vmem:[#allocation2 + $0x38] sm:$0xff] }
  0x1e   :  { %v793_v57 = vld [vmem:[%s1023_s3] ss:$0 sm:$0xff] }
  0x1f   :  { %478 = vmatpush.bf16.msra.mxu2 %v782_v47 }
  0x20   :  { %234 = vmatpush.bf16.msra.mxu0 %v772_v3 }
  0x23   :  { %479 = vmatpush.bf16.msra.mxu2 %v781_v48 }
  0x24   :  { %235 = vmatpush.bf16.msra.mxu0 %v771_v4 }
  0x27   :  { %480 = vmatpush.bf16.msra.mxu2 %v780_v49 }
  0x28   :  { %236 = vmatpush.bf16.msra.mxu0 %v770_v5 }
  0x2b   :  { %481 = vmatpush.bf16.msra.mxu2 %v779_v50 }
  0x2c   :  { %237 = vmatpush.bf16.msra.mxu0 %v769_v6 }
  0x2f   :  { %482 = vmatpush.bf16.msra.mxu2 %v778_v52 }
  0x30   :  { %238 = vmatpush.bf16.msra.mxu0 %v768_v7 }
  0x33   :  { %239 = vmatmul.bf16.vlgmr.msra.gmra.mxu0 %v760_v8  ;;  %483 = vmatpush.bf16.msra.mxu2 %v777_v53 }
  0x37   :  { %484 = vmatpush.bf16.msra.mxu2 %v776_v54 }
  0x43   :  { %244 = vmatmul.bf16.gmra.mxu0 %v761_v9 }
  0x53   :  { %249 = vmatmul.bf16.gmra.mxu0 %v762_v10 }
  0x63   :  { %254 = vmatmul.bf16.gmra.mxu0 %v763_v11 }
  0x73   :  { %259 = vmatmul.bf16.gmra.mxu0 %v764_v12 }
  0x83   :  { %264 = vmatmul.bf16.gmra.mxu0 %v765_v13 }
  0x93   :  { %269 = vmatmul.bf16.gmra.mxu0 %v766_v14 }
  0xa3   :  { %274 = vmatmul.bf16.gmra.mxu0 %v767_v15 }
  0xb0   :  { %v240_v16 = vpop.f32.mrf.mxu0 }
  0xb8   :  { %v242_v17 = vpop.f32.mrf.mxu0 }
  0xb9   :  { %v280_v18 = vpack.c.bf16 %v242_v17, %v240_v16 }
  0xc0   :  { %v245_v19 = vpop.f32.mrf.mxu0 }
  0xc8   :  { %v247_v20 = vpop.f32.mrf.mxu0 }
  0xc9   :  { %v281_v21 = vpack.c.bf16 %v247_v20, %v245_v19 }
  0xd0   :  { %v250_v22 = vpop.f32.mrf.mxu0 }
  0xd8   :  { %v252_v23 = vpop.f32.mrf.mxu0 }
  0xd9   :  { %v282_v24 = vpack.c.bf16 %v252_v23, %v250_v22 }
  0xe0   :  { %v255_v25 = vpop.f32.mrf.mxu0 }
  0xe8   :  { %v257_v26 = vpop.f32.mrf.mxu0 }
  0xe9   :  { %v283_v27 = vpack.c.bf16 %v257_v26, %v255_v25 }
  0xf0   :  { %v260_v28 = vpop.f32.mrf.mxu0 }
  0xf8   :  { %v262_v29 = vpop.f32.mrf.mxu0 }
  0xf9   :  { %v284_v39 = vpack.c.bf16 %v262_v29, %v260_v28 }
 0x100   :  { %v265_v30 = vpop.f32.mrf.mxu0 }
 0x108   :  { %v267_v31 = vpop.f32.mrf.mxu0 }
 0x109   :  { %v285_v38 = vpack.c.bf16 %v267_v31, %v265_v30 }
 0x110   :  { %v270_v32 = vpop.f32.mrf.mxu0 }
 0x118   :  { %v272_v33 = vpop.f32.mrf.mxu0 }
 0x119   :  { %v286_v37 = vpack.c.bf16 %v272_v33, %v270_v32 }
 0x120   :  { %v275_v34 = vpop.f32.mrf.mxu0 }
 0x128   :  { %v277_v35 = vpop.f32.mrf.mxu0 }
 0x129   :  { %v287_v36 = vpack.c.bf16 %v277_v35, %v275_v34 }
 0x12b   :  { %340 = vmatpush.bf16.msra.mxu1 %v287_v36 }
 0x12f   :  { %341 = vmatpush.bf16.msra.mxu1 %v286_v37 }
 0x133   :  { %342 = vmatpush.bf16.msra.mxu1 %v285_v38 }
 0x137   :  { %343 = vmatpush.bf16.msra.mxu1 %v284_v39 }
 0x13b   :  { %344 = vmatpush.bf16.msra.mxu1 %v283_v27 }
 0x13f   :  { %345 = vmatpush.bf16.msra.mxu1 %v282_v24 }
 0x143   :  { %346 = vmatpush.bf16.msra.mxu1 %v281_v21 }
 0x147   :  { %347 = vmatpush.bf16.msra.mxu1 %v280_v18 }
 0x14a   :  { %348 = vmatmul.bf16.vlgmr.msra.gmra.mxu1 %v979_v40 }
 0x15a   :  { %353 = vmatmul.bf16.gmra.mxu1 %v982_v41 }
 0x16a   :  { %358 = vmatmul.bf16.gmra.mxu1 %v985_v42 }
 0x17a   :  { %363 = vmatmul.bf16.gmra.mxu1 %v988_v43 }
 0x18a   :  { %368 = vmatmul.bf16.gmra.mxu1 %v991_v44 }
 0x19a   :  { %373 = vmatmul.bf16.gmra.mxu1 %v994_v46 }
 0x1aa   :  { %378 = vmatmul.bf16.gmra.mxu1 %v997_v51 }
 0x1ba   :  { %383 = vmatmul.bf16.gmra.mxu1 %v1000_v55 }
 0x1c7   :  { %v349_v56 = vpop.f32.mrf.mxu1 }
 0x1c8   :  { %v350_v58 = vadd.f32 %v793_v57, %v349_v56 }
 0x1ca   :  { %v389_v61 = vmax.f32 %v350_v58, 0.0 }
 0x1cf   :  { %v351_v59 = vpop.f32.mrf.mxu1 }
 0x1d0   :  { %v352_v60 = vadd.f32 %v793_v57, %v351_v59 }
 0x1d2   :  { %v390_v62 = vmax.f32 %v352_v60, 0.0 }
 0x1d4   :  { %v405_v63 = vpack.c.bf16 %v390_v62, %v389_v61 }
 0x1d6   :  { %485 = vmatmul.bf16.vlgmr.msra.gmra.mxu2 %v405_v63 }
 0x1d7   :  { %v354_v0 = vpop.f32.mrf.mxu1 }
 0x1d8   :  { %v355_v1 = vadd.f32 %v793_v57, %v354_v0 }
 0x1da   :  { %v391_v4 = vmax.f32 %v355_v1, 0.0 }
 0x1df   :  { %v356_v2 = vpop.f32.mrf.mxu1 }
 0x1e0   :  { %v357_v3 = vadd.f32 %v793_v57, %v356_v2 }
 0x1e2   :  { %v392_v5 = vmax.f32 %v357_v3, 0.0 }
 0x1e4   :  { %v406_v6 = vpack.c.bf16 %v392_v5, %v391_v4 }
 0x1e6   :  { %490 = vmatmul.bf16.gmra.mxu2 %v406_v6 }
 0x1e7   :  { %v359_v7 = vpop.f32.mrf.mxu1 }
 0x1e8   :  { %v360_v8 = vadd.f32 %v793_v57, %v359_v7 }
 0x1ea   :  { %v393_v11 = vmax.f32 %v360_v8, 0.0 }
 0x1ef   :  { %v361_v9 = vpop.f32.mrf.mxu1 }
 0x1f0   :  { %v362_v10 = vadd.f32 %v793_v57, %v361_v9 }
 0x1f2   :  { %v394_v12 = vmax.f32 %v362_v10, 0.0 }
 0x1f4   :  { %v407_v13 = vpack.c.bf16 %v394_v12, %v393_v11 }
 0x1f6   :  { %495 = vmatmul.bf16.gmra.mxu2 %v407_v13 }
 0x1f7   :  { %v364_v14 = vpop.f32.mrf.mxu1 }
 0x1f8   :  { %v365_v15 = vadd.f32 %v793_v57, %v364_v14 }
 0x1fa   :  { %v395_v18 = vmax.f32 %v365_v15, 0.0 }
 0x1ff   :  { %v366_v16 = vpop.f32.mrf.mxu1 }
 0x200   :  { %v367_v17 = vadd.f32 %v793_v57, %v366_v16 }
 0x202   :  { %v396_v19 = vmax.f32 %v367_v17, 0.0  ;;  %v794_v17 = vld [vmem:[%s1025_s5] ss:$0 sm:$0xff]  ;;  %s929_s5 = smov [#allocation10]  }
 0x203   :  { %s607_s18 = sshll.u32 %s929_s5, 4  ;;  %s608_s18 = int_to_ptr.vmem [resolvable:$true] %s607_s18 }
 0x204   :  { %v408_v20 = vpack.c.bf16 %v396_v19, %v395_v18 }
 0x206   :  { %500 = vmatmul.bf16.gmra.mxu2 %v408_v20 }
 0x207   :  { %v369_v21 = vpop.f32.mrf.mxu1 }
 0x208   :  { %v370_v22 = vadd.f32 %v793_v57, %v369_v21 }
 0x20a   :  { %v397_v25 = vmax.f32 %v370_v22, 0.0 }
 0x20f   :  { %v371_v23 = vpop.f32.mrf.mxu1 }
 0x210   :  { %v372_v24 = vadd.f32 %v793_v57, %v371_v23 }
 0x212   :  { %v398_v26 = vmax.f32 %v372_v24, 0.0 }
 0x214   :  { %v409_v27 = vpack.c.bf16 %v398_v26, %v397_v25 }
 0x216   :  { %505 = vmatmul.bf16.gmra.mxu2 %v409_v27 }
 0x217   :  { %v374_v28 = vpop.f32.mrf.mxu1 }
 0x218   :  { %v375_v29 = vadd.f32 %v793_v57, %v374_v28 }
 0x21a   :  { %v399_v32 = vmax.f32 %v375_v29, 0.0 }
 0x21f   :  { %v376_v30 = vpop.f32.mrf.mxu1 }
 0x220   :  { %v377_v31 = vadd.f32 %v793_v57, %v376_v30 }
 0x222   :  { %v400_v33 = vmax.f32 %v377_v31, 0.0 }
 0x224   :  { %v410_v34 = vpack.c.bf16 %v400_v33, %v399_v32 }
 0x226   :  { %510 = vmatmul.bf16.gmra.mxu2 %v410_v34 }
 0x227   :  { %v379_v35 = vpop.f32.mrf.mxu1 }
 0x228   :  { %v380_v36 = vadd.f32 %v793_v57, %v379_v35 }
 0x22a   :  { %v401_v39 = vmax.f32 %v380_v36, 0.0 }
 0x22f   :  { %v381_v37 = vpop.f32.mrf.mxu1 }
 0x230   :  { %v382_v38 = vadd.f32 %v793_v57, %v381_v37 }
 0x232   :  { %v402_v45 = vmax.f32 %v382_v38, 0.0 }
 0x234   :  { %v411_v47 = vpack.c.bf16 %v402_v45, %v401_v39 }
 0x236   :  { %515 = vmatmul.bf16.gmra.mxu2 %v411_v47 }
 0x237   :  { %v384_v48 = vpop.f32.mrf.mxu1 }
 0x238   :  { %v385_v49 = vadd.f32 %v793_v57, %v384_v48 }
 0x23a   :  { %v403_v53 = vmax.f32 %v385_v49, 0.0 }
 0x23f   :  { %v386_v50 = vpop.f32.mrf.mxu1 }
 0x240   :  { %v387_v52 = vadd.f32 %v793_v57, %v386_v50 }
 0x242   :  { %v404_v54 = vmax.f32 %v387_v52, 0.0 }
 0x244   :  { %v412_v56 = vpack.c.bf16 %v404_v54, %v403_v53 }
 0x246   :  { %520 = vmatmul.bf16.gmra.mxu2 %v412_v56 }
 0x259   :  { %v486_v58 = vpop.f32.mrf.mxu2 }
 0x261   :  { %v488_v59 = vpop.f32.mrf.mxu2 }
 0x262   :  { %v526_v60 = vpack.c.bf16 %v488_v59, %v486_v58 }
 0x269   :  { %v491_v61 = vpop.f32.mrf.mxu2 }
 0x271   :  { %v493_v62 = vpop.f32.mrf.mxu2 }
 0x272   :  { %v527_v63 = vpack.c.bf16 %v493_v62, %v491_v61 }
 0x279   :  { %v496_v0 = vpop.f32.mrf.mxu2 }
 0x281   :  { %v498_v1 = vpop.f32.mrf.mxu2 }
 0x282   :  { %v528_v2 = vpack.c.bf16 %v498_v1, %v496_v0 }
 0x289   :  { %v501_v3 = vpop.f32.mrf.mxu2 }
 0x291   :  { %v503_v4 = vpop.f32.mrf.mxu2 }
 0x292   :  { %v529_v5 = vpack.c.bf16 %v503_v4, %v501_v3 }
 0x299   :  { %v506_v6 = vpop.f32.mrf.mxu2 }
 0x2a1   :  { %v508_v7 = vpop.f32.mrf.mxu2 }
 0x2a2   :  { %v530_v16 = vpack.c.bf16 %v508_v7, %v506_v6 }
 0x2a9   :  { %v511_v8 = vpop.f32.mrf.mxu2 }
 0x2b1   :  { %v513_v57 = vpop.f32.mrf.mxu2 }
 0x2b2   :  { %v531_v15 = vpack.c.bf16 %v513_v57, %v511_v8 }
 0x2b9   :  { %v516_v9 = vpop.f32.mrf.mxu2 }
 0x2c1   :  { %v518_v10 = vpop.f32.mrf.mxu2 }
 0x2c2   :  { %v532_v14 = vpack.c.bf16 %v518_v10, %v516_v9 }
 0x2c9   :  { %v521_v11 = vpop.f32.mrf.mxu2 }
 0x2d1   :  { %v523_v12 = vpop.f32.mrf.mxu2 }
 0x2d2   :  { %v533_v13 = vpack.c.bf16 %v523_v12, %v521_v11 }
 0x2d4   :  { %538 = vmatpush.bf16.msra.mxu3 %v533_v13 }
 0x2d8   :  { %539 = vmatpush.bf16.msra.mxu3 %v532_v14 }
 0x2dc   :  { %540 = vmatpush.bf16.msra.mxu3 %v531_v15 }
 0x2e0   :  { %541 = vmatpush.bf16.msra.mxu3 %v530_v16 }
 0x2e4   :  { %542 = vmatpush.bf16.msra.mxu3 %v529_v5 }
 0x2e8   :  { %543 = vmatpush.bf16.msra.mxu3 %v528_v2 }
 0x2ec   :  { %544 = vmatpush.bf16.msra.mxu3 %v527_v63 }
 0x2f0   :  { %545 = vmatpush.bf16.msra.mxu3 %v526_v60 }
 0x2f3   :  { %546 = vmatmul.bf16.vlgmr.msra.gmra.mxu3 %v979_v40 }
 0x303   :  { %551 = vmatmul.bf16.gmra.mxu3 %v982_v41 }
 0x313   :  { %556 = vmatmul.bf16.gmra.mxu3 %v985_v42 }
 0x323   :  { %561 = vmatmul.bf16.gmra.mxu3 %v988_v43 }
 0x333   :  { %566 = vmatmul.bf16.gmra.mxu3 %v991_v44 }
 0x343   :  { %571 = vmatmul.bf16.gmra.mxu3 %v994_v46 }
 0x353   :  { %576 = vmatmul.bf16.gmra.mxu3 %v997_v51 }
 0x363   :  { %581 = vmatmul.bf16.gmra.mxu3 %v1000_v55 }
 0x376   :  { %v547_v18 = vpop.f32.mrf.mxu3 }
 0x377   :  { %v548_v40 = vadd.f32 %v794_v17, %v547_v18 }
 0x379   :  { %587 = vst [vmem:[#allocation10] sm:$0xff] %v548_v40 }
 0x37e   :  { %v549_v41 = vpop.f32.mrf.mxu3 }
 0x37f   :  { %v550_v19 = vadd.f32 %v794_v17, %v549_v41 }
 0x381   :  { %588 = vst [vmem:[#allocation10 + $0x8] sm:$0xff] %v550_v19 }
 0x386   :  { %v552_v42 = vpop.f32.mrf.mxu3 }
 0x387   :  { %v553_v43 = vadd.f32 %v794_v17, %v552_v42 }
 0x389   :  { %589 = vst [vmem:[#allocation10 + $0x10] sm:$0xff] %v553_v43 }
 0x38e   :  { %v554_v44 = vpop.f32.mrf.mxu3 }
 0x38f   :  { %v555_v20 = vadd.f32 %v794_v17, %v554_v44 }
 0x391   :  { %590 = vst [vmem:[#allocation10 + $0x18] sm:$0xff] %v555_v20 }
 0x396   :  { %v557_v46 = vpop.f32.mrf.mxu3 }
 0x397   :  { %v558_v51 = vadd.f32 %v794_v17, %v557_v46 }
 0x399   :  { %591 = vst [vmem:[#allocation10 + $0x20] sm:$0xff] %v558_v51 }
 0x39e   :  { %v559_v55 = vpop.f32.mrf.mxu3 }
 0x39f   :  { %v560_v21 = vadd.f32 %v794_v17, %v559_v55 }
 0x3a1   :  { %592 = vst [vmem:[#allocation10 + $0x28] sm:$0xff] %v560_v21 }
 0x3a6   :  { %v562_v22 = vpop.f32.mrf.mxu3 }
 0x3a7   :  { %v563_v23 = vadd.f32 %v794_v17, %v562_v22 }
 0x3a9   :  { %593 = vst [vmem:[#allocation10 + $0x30] sm:$0xff] %v563_v23 }
 0x3ae   :  { %v564_v24 = vpop.f32.mrf.mxu3 }
 0x3af   :  { %v565_v25 = vadd.f32 %v794_v17, %v564_v24 }
 0x3b1   :  { %594 = vst [vmem:[#allocation10 + $0x38] sm:$0xff] %v565_v25 }
 0x3b6   :  { %v567_v26 = vpop.f32.mrf.mxu3 }
 0x3b7   :  { %v568_v27 = vadd.f32 %v794_v17, %v567_v26 }
 0x3b9   :  { %595 = vst [vmem:[#allocation10 + $0x40] sm:$0xff] %v568_v27 }
 0x3be   :  { %v569_v28 = vpop.f32.mrf.mxu3 }
 0x3bf   :  { %v570_v29 = vadd.f32 %v794_v17, %v569_v28 }
 0x3c1   :  { %596 = vst [vmem:[#allocation10 + $0x48] sm:$0xff] %v570_v29 }
 0x3c6   :  { %v572_v30 = vpop.f32.mrf.mxu3 }
 0x3c7   :  { %v573_v31 = vadd.f32 %v794_v17, %v572_v30 }
 0x3c9   :  { %597 = vst [vmem:[#allocation10 + $0x50] sm:$0xff] %v573_v31 }
 0x3ce   :  { %v574_v32 = vpop.f32.mrf.mxu3 }
 0x3cf   :  { %v575_v33 = vadd.f32 %v794_v17, %v574_v32 }
 0x3d1   :  { %598 = vst [vmem:[#allocation10 + $0x58] sm:$0xff] %v575_v33 }
 0x3d6   :  { %v577_v34 = vpop.f32.mrf.mxu3 }
 0x3d7   :  { %v578_v35 = vadd.f32 %v794_v17, %v577_v34 }
 0x3d9   :  { %599 = vst [vmem:[#allocation10 + $0x60] sm:$0xff] %v578_v35 }
 0x3de   :  { %v579_v36 = vpop.f32.mrf.mxu3 }
 0x3df   :  { %v580_v37 = vadd.f32 %v794_v17, %v579_v36 }
 0x3e1   :  { %600 = vst [vmem:[#allocation10 + $0x68] sm:$0xff] %v580_v37 }
 0x3e6   :  { %v582_v38 = vpop.f32.mrf.mxu3 }
 0x3e7   :  { %v583_v39 = vadd.f32 %v794_v17, %v582_v38 }
 0x3e9   :  { %601 = vst [vmem:[#allocation10 + $0x70] sm:$0xff] %v583_v39 }
 0x3ee   :  { %v584_v45 = vpop.f32.mrf.mxu3 }
 0x3ef   :  { %v585_v47 = vadd.f32 %v794_v17, %v584_v45 }
 0x3f1   :  { %602 = vst [vmem:[#allocation10 + $0x78] sm:$0xff] %v585_v47 }
 0x3f2   :  { %615 = dma.vmem_to_hbm [thread:$0]  %s608_s18, 2048, %s610_s21, [#allocation4], %s930_s22, %s930_s22, %s931_s23  }
 0x3f3   :  { %921 = dma.done.wait [#allocation4], 2048  }
 0x3f4   :  { %922 = vsyncadd [#allocation4], 4294965248 }
 0x3f5   :  { %620 = vsyncpa [#allocation3], 1 }
 0x3f6   :  { %621 = vsyncpa [#allocation6], 1 }
 0x3f7   :  { %622 = vsyncpa [#allocation9], 1 }
 0x3f8   :  { %623 = vsyncpa [#allocation4], 1 }

</bundles_post_ra>
